<compile_context>
chip_gen: v5e
topology: v5e:2x2
jax: 0.10.0
libtpu: 0.0.40
codegen_flags: <defaults>
</compile_context>

<pallas_src>
import functools

import jax
import jax.numpy as jnp
from jax.experimental import pallas as pl
from jax.experimental.pallas import tpu as pltpu


def _gat_kernel(xq_ref, xkv_ref, adj_ref, wT_ref, ssrc_ref, sdst_ref,
                bias_ref, o_ref, *, head, k):
    # xq_ref  : (1, TQ, F_in)  bf16  query-row node features
    # xkv_ref : (1, N,  F_in)  bf16  all node features (key/value side)
    # adj_ref : (1, TQ, N)     int8  adjacency mask rows for this query tile
    # wT_ref  : (F_in, F_out)  bf16  projection weight, pre-transposed
    # ssrc_ref: (F_out, head)  bf16  block-structured a_src matrix
    # sdst_ref: (F_out, head)  bf16  block-structured a_dst matrix
    # bias_ref: (1, head)      f32   per-head attention bias
    # o_ref   : (1, TQ, F_out) f32
    xq = xq_ref[0]
    xkv = xkv_ref[0]
    keep = adj_ref[0].astype(jnp.float32) > 0.0                     # (TQ, N)

    wT = wT_ref[...]
    # Projection (Linear, no bias) on the MXU, f32 accumulation.
    hq = jnp.dot(xq, wT, preferred_element_type=jnp.float32)        # (TQ, F_out)
    hkv = jnp.dot(xkv, wT, preferred_element_type=jnp.float32)      # (N, F_out)
    hq_b = hq.astype(jnp.bfloat16)
    hkv_b = hkv.astype(jnp.bfloat16)

    # All heads' src/dst terms via two MXU matmuls; bias folded into src term.
    #   src_all[:, h] = a_src[h] . h_q(head h) + b[h]
    #   dst_all[:, h] = a_dst[h] . h_kv(head h)
    src_all = jnp.dot(hq_b, ssrc_ref[...],
                      preferred_element_type=jnp.float32) + bias_ref[...]   # (TQ, head)
    dst_all = jnp.dot(hkv_b, sdst_ref[...],
                      preferred_element_type=jnp.float32)                    # (N, head)

    for hh in range(head):               # head is small & static -> unrolled
        e = src_all[:, hh:hh + 1] + dst_all[:, hh][None, :]          # (TQ, N)
        e = jnp.where(e >= 0.0, e, 0.2 * e)                          # leaky_relu(0.2)
        e = jnp.where(keep, e, -1e30)                                # masking
        m = jnp.max(e, axis=-1, keepdims=True)
        p = jnp.exp(e - m)                                           # unnormalized probs
        l = jnp.sum(p, axis=-1, keepdims=True)
        inv_l = pl.reciprocal(l, approx=True)                        # EUP slot (~free)
        # aggregation with deferred normalization, then ReLU; write the head's
        # lane slice of the output directly (no concat).
        agg = jnp.dot(p.astype(jnp.bfloat16), hkv_b[:, hh * k:(hh + 1) * k],
                      preferred_element_type=jnp.float32)            # (TQ, k)
        o_ref[0, :, hh * k:(hh + 1) * k] = jnp.maximum(agg * inv_l, 0.0)


def _choose_query_tile(n):
    """Query-row tile: full N when small, else a 32-multiple that divides N."""
    if n <= 256:
        return n
    for tq in (256, 128, 64, 32):
        if n % tq == 0:
            return tq
    return n


def _vmem_bytes_estimate(n, tq, fin, fout, head):
    bf16, f32, i8 = 2, 4, 1
    # double-buffered pipeline blocks
    blocks = 2 * (tq * fin * bf16 + n * fin * bf16 + tq * n * i8 + tq * fout * f32)
    params = fin * fout * bf16 + 2 * fout * head * bf16 + head * f32
    # in-body temporaries: h (f32 + bf16) and a few (TQ, N) f32 tiles
    temps = n * fout * (f32 + bf16) + tq * fout * (f32 + bf16) + 6 * tq * n * f32
    return blocks + params + temps


@functools.partial(jax.jit, static_argnames=("head",))
def gat_layer(x, A, W, att_w, att_b, *, head):
    """x: (B, N, F_in) f32, A: (B, N, N) f32 (>0 keep),
    W: (F_out, F_in) f32 (torch Linear weight layout),
    att_w: (head, 1, 2k) f32, att_b: (head, 1) f32 (per-head Linear(2k, 1))."""
    B, N, Fin = x.shape
    Fout = W.shape[0]
    k = Fout // head
    TQ = _choose_query_tile(N)
    n_q = N // TQ

    # --- glue: parameter reshuffling only ---
    wT = W.T.astype(jnp.bfloat16)                                  # (F_in, F_out)
    a_full = att_w.reshape(head, 2 * k)
    asrc, adst = a_full[:, :k], a_full[:, k:]                      # (head, k) each
    eye = jnp.eye(head, dtype=att_w.dtype)
    # block-structured (F_out, head): column h holds a_src[h]/a_dst[h] in rows h*k:(h+1)*k
    Ssrc = jnp.einsum("hk,hg->hkg", asrc, eye).reshape(Fout, head).astype(jnp.bfloat16)
    Sdst = jnp.einsum("hk,hg->hkg", adst, eye).reshape(Fout, head).astype(jnp.bfloat16)
    bias = att_b.reshape(1, head).astype(jnp.float32)

    x_b = x.astype(jnp.bfloat16)
    A_i8 = (A > 0).astype(jnp.int8)                                # 4x less mask DMA

    vmem_limit = int(min(max(_vmem_bytes_estimate(N, TQ, Fin, Fout, head) * 1.4,
                             32 * 1024 * 1024), 56 * 1024 * 1024))

    kernel = functools.partial(_gat_kernel, head=head, k=k)
    return pl.pallas_call(
        kernel,
        out_shape=jax.ShapeDtypeStruct((B, N, Fout), jnp.float32),
        grid_spec=pltpu.PrefetchScalarGridSpec(
            num_scalar_prefetch=0,
            grid=(B, n_q),
            in_specs=[
                pl.BlockSpec((1, TQ, Fin), lambda b, q: (b, q, 0)),   # x (query rows)
                pl.BlockSpec((1, N, Fin), lambda b, q: (b, 0, 0)),    # x (all rows)
                pl.BlockSpec((1, TQ, N), lambda b, q: (b, q, 0)),     # adjacency (int8)
                pl.BlockSpec((Fin, Fout), lambda b, q: (0, 0)),       # W^T
                pl.BlockSpec((Fout, head), lambda b, q: (0, 0)),      # S_src
                pl.BlockSpec((Fout, head), lambda b, q: (0, 0)),      # S_dst
                pl.BlockSpec((1, head), lambda b, q: (0, 0)),         # bias
            ],
            out_specs=pl.BlockSpec((1, TQ, Fout), lambda b, q: (b, q, 0)),
        ),
        compiler_params=pltpu.CompilerParams(
            dimension_semantics=("parallel", "parallel"),
            vmem_limit_bytes=vmem_limit),
    )(x_b, x_b, A_i8, wT, Ssrc, Sdst, bias)


def gat_ref(x, A, W, att_w, att_b, *, head):
    """Pure-JAX f32 mirror of the torch forward (for verification)."""
    B, N, _ = x.shape
    Fout = W.shape[0]
    k = Fout // head
    h = x @ W.T
    h = h.reshape(B, N, head, k).transpose(0, 2, 1, 3)              # (B,h,N,k)
    Wi = jnp.repeat(h, N, axis=2)                                   # repeat_interleave
    Wj = jnp.tile(h, (1, 1, N, 1))                                  # repeat
    cat = jnp.concatenate([Wi, Wj], axis=-1).reshape(B, head, N, N, 2 * k)
    att = jnp.einsum("bhpqf,hf->bhpq", cat, att_w.reshape(head, 2 * k))
    att = att + att_b.reshape(1, head, 1, 1)
    att = jnp.where(att >= 0, att, 0.2 * att)                       # leaky_relu(0.2)
    mask = (A > 0)[:, None, :, :]
    att = jnp.where(mask, att, -1e30)
    att = jax.nn.softmax(att, axis=-1)
    out = jnp.maximum(jnp.einsum("bhpq,bhqk->bhpk", att, h), 0.0)
    return out.transpose(0, 2, 1, 3).reshape(B, N, Fout)


if __name__ == "__main__":
    # small shapes consistent with the module
    B, N = 2, 16
    input_size, output_size, head = 32, 32, 4
    k = output_size // head

    key = jax.random.PRNGKey(0)
    kx, ka, kw, kaw, kab = jax.random.split(key, 5)

    x = jax.random.normal(kx, (B, N, input_size), dtype=jnp.float32)
    # adjacency: random 0/1 mask, self-loops guaranteed
    A = (jax.random.uniform(ka, (B, N, N)) > 0.5).astype(jnp.float32)
    A = jnp.maximum(A, jnp.eye(N, dtype=jnp.float32)[None])

    # deterministic parameter init (same shapes as the torch module's params)
    W = 0.1 * jax.random.normal(kw, (output_size, input_size), dtype=jnp.float32)
    att_w = 0.1 * jax.random.normal(kaw, (head, 1, 2 * k), dtype=jnp.float32)
    att_b = 0.1 * jax.random.normal(kab, (head, 1), dtype=jnp.float32)

    out = gat_layer(x, A, W, att_w, att_b, head=head)
    out = jax.block_until_ready(out)

    ref = gat_ref(x, A, W, att_w, att_b, head=head)
    assert out.shape == (B, N, output_size)
    # bf16 MXU operands + approximate EUP reciprocal -> loosened tolerance
    assert jnp.allclose(out, ref, atol=3e-2, rtol=3e-2), "mismatch vs JAX reference"

    print("KERNEL_OK")
</pallas_src>

<mosaic_0001>
module attributes {stable_mosaic.version = 11 : i64} {
  func.func @_gat_kernel(%arg0: i32, %arg1: i32, %arg2: memref<1x16x32xbf16, #tpu.memory_space<vmem>>, %arg3: memref<1x16x32xbf16, #tpu.memory_space<vmem>>, %arg4: memref<1x16x16xi8, #tpu.memory_space<vmem>>, %arg5: memref<32x32xbf16, #tpu.memory_space<vmem>>, %arg6: memref<32x4xbf16, #tpu.memory_space<vmem>>, %arg7: memref<32x4xbf16, #tpu.memory_space<vmem>>, %arg8: memref<1x4xf32, #tpu.memory_space<vmem>>, %arg9: memref<1x16x32xf32, #tpu.memory_space<vmem>>) attributes {dimension_semantics = [#tpu.dimension_semantics<parallel>, #tpu.dimension_semantics<parallel>], iteration_bounds = array<i64: 2, 1>, scalar_prefetch = 0 : i64, scratch_operands = 0 : i64, tpu.core_type = #tpu.core_type<tc>, window_params = [{transform_indices = @transform_0, window_bounds = array<i64: 1, 16, 32>}, {transform_indices = @transform_1, window_bounds = array<i64: 1, 16, 32>}, {transform_indices = @transform_2, window_bounds = array<i64: 1, 16, 16>}, {pipeline_mode = #tpu.pipeline_mode<synchronous>, transform_indices = @transform_3, window_bounds = array<i64: 32, 32>}, {pipeline_mode = #tpu.pipeline_mode<synchronous>, transform_indices = @transform_4, window_bounds = array<i64: 32, 4>}, {pipeline_mode = #tpu.pipeline_mode<synchronous>, transform_indices = @transform_5, window_bounds = array<i64: 32, 4>}, {pipeline_mode = #tpu.pipeline_mode<synchronous>, transform_indices = @transform_6, window_bounds = array<i64: 1, 4>}, {transform_indices = @transform_7, window_bounds = array<i64: 1, 16, 32>}]} {
    %c0 = arith.constant 0 : index
    %c0_0 = arith.constant 0 : index
    %c0_1 = arith.constant 0 : index
    %0 = vector.load %arg2[%c0, %c0_0, %c0_1] : memref<1x16x32xbf16, #tpu.memory_space<vmem>>, vector<1x16x32xbf16>
    %1 = vector.shape_cast %0 : vector<1x16x32xbf16> to vector<16x32xbf16>
    %c0_2 = arith.constant 0 : index
    %c0_3 = arith.constant 0 : index
    %c0_4 = arith.constant 0 : index
    %2 = vector.load %arg3[%c0_2, %c0_3, %c0_4] : memref<1x16x32xbf16, #tpu.memory_space<vmem>>, vector<1x16x32xbf16>
    %3 = vector.shape_cast %2 : vector<1x16x32xbf16> to vector<16x32xbf16>
    %c0_5 = arith.constant 0 : index
    %c0_6 = arith.constant 0 : index
    %c0_7 = arith.constant 0 : index
    %4 = vector.load %arg4[%c0_5, %c0_6, %c0_7] : memref<1x16x16xi8, #tpu.memory_space<vmem>>, vector<1x16x16xi8>
    %5 = vector.shape_cast %4 : vector<1x16x16xi8> to vector<16x16xi8>
    %6 = arith.sitofp %5 : vector<16x16xi8> to vector<16x16xf32>
    %cst = arith.constant 0.000000e+00 : f32
    %7 = vector.broadcast %cst : f32 to vector<16x16xf32>
    %8 = arith.cmpf ogt, %6, %7 : vector<16x16xf32>
    %c0_8 = arith.constant 0 : index
    %c0_9 = arith.constant 0 : index
    %9 = vector.load %arg5[%c0_8, %c0_9] : memref<32x32xbf16, #tpu.memory_space<vmem>>, vector<32x32xbf16>
    %cst_10 = arith.constant dense<0.000000e+00> : vector<16x32xf32>
    %10 = tpu.matmul %1, %9, %cst_10 {dimension_numbers = #tpu.dot_dimension_numbers<[1], [0], [0], [1], [0, 0, 1, 1], [], []>} : vector<16x32xbf16>, vector<32x32xbf16>, vector<16x32xf32> -> vector<16x32xf32>
    %cst_11 = arith.constant dense<0.000000e+00> : vector<16x32xf32>
    %11 = tpu.matmul %3, %9, %cst_11 {dimension_numbers = #tpu.dot_dimension_numbers<[1], [0], [0], [1], [0, 0, 1, 1], [], []>} : vector<16x32xbf16>, vector<32x32xbf16>, vector<16x32xf32> -> vector<16x32xf32>
    %12 = arith.truncf %10 : vector<16x32xf32> to vector<16x32xbf16>
    %13 = arith.truncf %11 : vector<16x32xf32> to vector<16x32xbf16>
    %c0_12 = arith.constant 0 : index
    %c0_13 = arith.constant 0 : index
    %14 = vector.load %arg6[%c0_12, %c0_13] : memref<32x4xbf16, #tpu.memory_space<vmem>>, vector<32x4xbf16>
    %cst_14 = arith.constant dense<0.000000e+00> : vector<16x4xf32>
    %15 = tpu.matmul %12, %14, %cst_14 {dimension_numbers = #tpu.dot_dimension_numbers<[1], [0], [0], [1], [0, 0, 1, 1], [], []>} : vector<16x32xbf16>, vector<32x4xbf16>, vector<16x4xf32> -> vector<16x4xf32>
    %c0_15 = arith.constant 0 : index
    %c0_16 = arith.constant 0 : index
    %16 = vector.load %arg8[%c0_15, %c0_16] : memref<1x4xf32, #tpu.memory_space<vmem>>, vector<1x4xf32>
    %17 = vector.broadcast %16 : vector<1x4xf32> to vector<16x4xf32>
    %18 = arith.addf %15, %17 : vector<16x4xf32>
    %c0_17 = arith.constant 0 : index
    %c0_18 = arith.constant 0 : index
    %19 = vector.load %arg7[%c0_17, %c0_18] : memref<32x4xbf16, #tpu.memory_space<vmem>>, vector<32x4xbf16>
    %cst_19 = arith.constant dense<0.000000e+00> : vector<16x4xf32>
    %20 = tpu.matmul %13, %19, %cst_19 {dimension_numbers = #tpu.dot_dimension_numbers<[1], [0], [0], [1], [0, 0, 1, 1], [], []>} : vector<16x32xbf16>, vector<32x4xbf16>, vector<16x4xf32> -> vector<16x4xf32>
    %21 = vector.extract_strided_slice %18 {offsets = [0, 0], sizes = [16, 1], strides = [1, 1]} : vector<16x4xf32> to vector<16x1xf32>
    %22 = vector.extract_strided_slice %20 {offsets = [0, 0], sizes = [16, 1], strides = [1, 1]} : vector<16x4xf32> to vector<16x1xf32>
    %23 = vector.shape_cast %22 : vector<16x1xf32> to vector<16xf32>
    %24 = vector.shape_cast %23 : vector<16xf32> to vector<1x16xf32>
    %25 = vector.broadcast %21 : vector<16x1xf32> to vector<16x16xf32>
    %26 = vector.broadcast %24 : vector<1x16xf32> to vector<16x16xf32>
    %27 = arith.addf %25, %26 : vector<16x16xf32>
    %cst_20 = arith.constant 0.000000e+00 : f32
    %28 = vector.broadcast %cst_20 : f32 to vector<16x16xf32>
    %29 = arith.cmpf oge, %27, %28 : vector<16x16xf32>
    %cst_21 = arith.constant 2.000000e-01 : f32
    %30 = vector.broadcast %cst_21 : f32 to vector<16x16xf32>
    %31 = arith.mulf %30, %27 : vector<16x16xf32>
    %32 = arith.select %29, %27, %31 : vector<16x16xi1>, vector<16x16xf32>
    %cst_22 = arith.constant -1.000000e+30 : f32
    %33 = vector.broadcast %cst_22 : f32 to vector<16x16xf32>
    %34 = arith.select %8, %32, %33 : vector<16x16xi1>, vector<16x16xf32>
    %cst_23 = arith.constant dense<0xFF800000> : vector<16xf32>
    %35 = vector.multi_reduction <maximumf>, %34, %cst_23 [1] : vector<16x16xf32> to vector<16xf32>
    %36 = vector.shape_cast %35 : vector<16xf32> to vector<16x1xf32>
    %37 = vector.broadcast %36 : vector<16x1xf32> to vector<16x16xf32>
    %38 = arith.subf %34, %37 : vector<16x16xf32>
    %39 = math.exp %38 : vector<16x16xf32>
    %cst_24 = arith.constant dense<0.000000e+00> : vector<16xf32>
    %40 = vector.multi_reduction <add>, %39, %cst_24 [1] : vector<16x16xf32> to vector<16xf32>
    %41 = vector.shape_cast %40 : vector<16xf32> to vector<16x1xf32>
    %42 = tpu.reciprocal %41 {approx = true} : vector<16x1xf32> -> vector<16x1xf32>
    %43 = arith.truncf %39 : vector<16x16xf32> to vector<16x16xbf16>
    %44 = vector.extract_strided_slice %13 {offsets = [0, 0], sizes = [16, 8], strides = [1, 1]} : vector<16x32xbf16> to vector<16x8xbf16>
    %cst_25 = arith.constant dense<0.000000e+00> : vector<16x8xf32>
    %45 = tpu.matmul %43, %44, %cst_25 {dimension_numbers = #tpu.dot_dimension_numbers<[1], [0], [0], [1], [0, 0, 1, 1], [], []>} : vector<16x16xbf16>, vector<16x8xbf16>, vector<16x8xf32> -> vector<16x8xf32>
    %46 = vector.broadcast %42 : vector<16x1xf32> to vector<16x8xf32>
    %47 = arith.mulf %45, %46 : vector<16x8xf32>
    %cst_26 = arith.constant 0.000000e+00 : f32
    %48 = vector.broadcast %cst_26 : f32 to vector<16x8xf32>
    %49 = arith.maximumf %47, %48 : vector<16x8xf32>
    %c0_27 = arith.constant 0 : index
    %c0_28 = arith.constant 0 : index
    %c0_29 = arith.constant 0 : index
    %50 = vector.load %arg9[%c0_27, %c0_28, %c0_29] : memref<1x16x32xf32, #tpu.memory_space<vmem>>, vector<1x16x8xf32>
    %51 = vector.shape_cast %50 : vector<1x16x8xf32> to vector<16x8xf32>
    %52 = vector.shape_cast %49 : vector<16x8xf32> to vector<1x16x8xf32>
    tpu.vector_store %arg9[%c0_27, %c0_28, %c0_29], %52 {strides = array<i32>} : memref<1x16x32xf32, #tpu.memory_space<vmem>>, vector<1x16x8xf32>,
    %53 = vector.extract_strided_slice %18 {offsets = [0, 1], sizes = [16, 1], strides = [1, 1]} : vector<16x4xf32> to vector<16x1xf32>
    %54 = vector.extract_strided_slice %20 {offsets = [0, 1], sizes = [16, 1], strides = [1, 1]} : vector<16x4xf32> to vector<16x1xf32>
    %55 = vector.shape_cast %54 : vector<16x1xf32> to vector<16xf32>
    %56 = vector.shape_cast %55 : vector<16xf32> to vector<1x16xf32>
    %57 = vector.broadcast %53 : vector<16x1xf32> to vector<16x16xf32>
    %58 = vector.broadcast %56 : vector<1x16xf32> to vector<16x16xf32>
    %59 = arith.addf %57, %58 : vector<16x16xf32>
    %cst_30 = arith.constant 0.000000e+00 : f32
    %60 = vector.broadcast %cst_30 : f32 to vector<16x16xf32>
    %61 = arith.cmpf oge, %59, %60 : vector<16x16xf32>
    %cst_31 = arith.constant 2.000000e-01 : f32
    %62 = vector.broadcast %cst_31 : f32 to vector<16x16xf32>
    %63 = arith.mulf %62, %59 : vector<16x16xf32>
    %64 = arith.select %61, %59, %63 : vector<16x16xi1>, vector<16x16xf32>
    %cst_32 = arith.constant -1.000000e+30 : f32
    %65 = vector.broadcast %cst_32 : f32 to vector<16x16xf32>
    %66 = arith.select %8, %64, %65 : vector<16x16xi1>, vector<16x16xf32>
    %cst_33 = arith.constant dense<0xFF800000> : vector<16xf32>
    %67 = vector.multi_reduction <maximumf>, %66, %cst_33 [1] : vector<16x16xf32> to vector<16xf32>
    %68 = vector.shape_cast %67 : vector<16xf32> to vector<16x1xf32>
    %69 = vector.broadcast %68 : vector<16x1xf32> to vector<16x16xf32>
    %70 = arith.subf %66, %69 : vector<16x16xf32>
    %71 = math.exp %70 : vector<16x16xf32>
    %cst_34 = arith.constant dense<0.000000e+00> : vector<16xf32>
    %72 = vector.multi_reduction <add>, %71, %cst_34 [1] : vector<16x16xf32> to vector<16xf32>
    %73 = vector.shape_cast %72 : vector<16xf32> to vector<16x1xf32>
    %74 = tpu.reciprocal %73 {approx = true} : vector<16x1xf32> -> vector<16x1xf32>
    %75 = arith.truncf %71 : vector<16x16xf32> to vector<16x16xbf16>
    %76 = vector.extract_strided_slice %13 {offsets = [0, 8], sizes = [16, 8], strides = [1, 1]} : vector<16x32xbf16> to vector<16x8xbf16>
    %cst_35 = arith.constant dense<0.000000e+00> : vector<16x8xf32>
    %77 = tpu.matmul %75, %76, %cst_35 {dimension_numbers = #tpu.dot_dimension_numbers<[1], [0], [0], [1], [0, 0, 1, 1], [], []>} : vector<16x16xbf16>, vector<16x8xbf16>, vector<16x8xf32> -> vector<16x8xf32>
    %78 = vector.broadcast %74 : vector<16x1xf32> to vector<16x8xf32>
    %79 = arith.mulf %77, %78 : vector<16x8xf32>
    %cst_36 = arith.constant 0.000000e+00 : f32
    %80 = vector.broadcast %cst_36 : f32 to vector<16x8xf32>
    %81 = arith.maximumf %79, %80 : vector<16x8xf32>
    %c0_37 = arith.constant 0 : index
    %c0_38 = arith.constant 0 : index
    %c8 = arith.constant 8 : index
    %82 = vector.load %arg9[%c0_37, %c0_38, %c8] : memref<1x16x32xf32, #tpu.memory_space<vmem>>, vector<1x16x8xf32>
    %83 = vector.shape_cast %82 : vector<1x16x8xf32> to vector<16x8xf32>
    %84 = vector.shape_cast %81 : vector<16x8xf32> to vector<1x16x8xf32>
    tpu.vector_store %arg9[%c0_37, %c0_38, %c8], %84 {strides = array<i32>} : memref<1x16x32xf32, #tpu.memory_space<vmem>>, vector<1x16x8xf32>,
    %85 = vector.extract_strided_slice %18 {offsets = [0, 2], sizes = [16, 1], strides = [1, 1]} : vector<16x4xf32> to vector<16x1xf32>
    %86 = vector.extract_strided_slice %20 {offsets = [0, 2], sizes = [16, 1], strides = [1, 1]} : vector<16x4xf32> to vector<16x1xf32>
    %87 = vector.shape_cast %86 : vector<16x1xf32> to vector<16xf32>
    %88 = vector.shape_cast %87 : vector<16xf32> to vector<1x16xf32>
    %89 = vector.broadcast %85 : vector<16x1xf32> to vector<16x16xf32>
    %90 = vector.broadcast %88 : vector<1x16xf32> to vector<16x16xf32>
    %91 = arith.addf %89, %90 : vector<16x16xf32>
    %cst_39 = arith.constant 0.000000e+00 : f32
    %92 = vector.broadcast %cst_39 : f32 to vector<16x16xf32>
    %93 = arith.cmpf oge, %91, %92 : vector<16x16xf32>
    %cst_40 = arith.constant 2.000000e-01 : f32
    %94 = vector.broadcast %cst_40 : f32 to vector<16x16xf32>
    %95 = arith.mulf %94, %91 : vector<16x16xf32>
    %96 = arith.select %93, %91, %95 : vector<16x16xi1>, vector<16x16xf32>
    %cst_41 = arith.constant -1.000000e+30 : f32
    %97 = vector.broadcast %cst_41 : f32 to vector<16x16xf32>
    %98 = arith.select %8, %96, %97 : vector<16x16xi1>, vector<16x16xf32>
    %cst_42 = arith.constant dense<0xFF800000> : vector<16xf32>
    %99 = vector.multi_reduction <maximumf>, %98, %cst_42 [1] : vector<16x16xf32> to vector<16xf32>
    %100 = vector.shape_cast %99 : vector<16xf32> to vector<16x1xf32>
    %101 = vector.broadcast %100 : vector<16x1xf32> to vector<16x16xf32>
    %102 = arith.subf %98, %101 : vector<16x16xf32>
    %103 = math.exp %102 : vector<16x16xf32>
    %cst_43 = arith.constant dense<0.000000e+00> : vector<16xf32>
    %104 = vector.multi_reduction <add>, %103, %cst_43 [1] : vector<16x16xf32> to vector<16xf32>
    %105 = vector.shape_cast %104 : vector<16xf32> to vector<16x1xf32>
    %106 = tpu.reciprocal %105 {approx = true} : vector<16x1xf32> -> vector<16x1xf32>
    %107 = arith.truncf %103 : vector<16x16xf32> to vector<16x16xbf16>
    %108 = vector.extract_strided_slice %13 {offsets = [0, 16], sizes = [16, 8], strides = [1, 1]} : vector<16x32xbf16> to vector<16x8xbf16>
    %cst_44 = arith.constant dense<0.000000e+00> : vector<16x8xf32>
    %109 = tpu.matmul %107, %108, %cst_44 {dimension_numbers = #tpu.dot_dimension_numbers<[1], [0], [0], [1], [0, 0, 1, 1], [], []>} : vector<16x16xbf16>, vector<16x8xbf16>, vector<16x8xf32> -> vector<16x8xf32>
    %110 = vector.broadcast %106 : vector<16x1xf32> to vector<16x8xf32>
    %111 = arith.mulf %109, %110 : vector<16x8xf32>
    %cst_45 = arith.constant 0.000000e+00 : f32
    %112 = vector.broadcast %cst_45 : f32 to vector<16x8xf32>
    %113 = arith.maximumf %111, %112 : vector<16x8xf32>
    %c0_46 = arith.constant 0 : index
    %c0_47 = arith.constant 0 : index
    %c16 = arith.constant 16 : index
    %114 = vector.load %arg9[%c0_46, %c0_47, %c16] : memref<1x16x32xf32, #tpu.memory_space<vmem>>, vector<1x16x8xf32>
    %115 = vector.shape_cast %114 : vector<1x16x8xf32> to vector<16x8xf32>
    %116 = vector.shape_cast %113 : vector<16x8xf32> to vector<1x16x8xf32>
    tpu.vector_store %arg9[%c0_46, %c0_47, %c16], %116 {strides = array<i32>} : memref<1x16x32xf32, #tpu.memory_space<vmem>>, vector<1x16x8xf32>,
    %117 = vector.extract_strided_slice %18 {offsets = [0, 3], sizes = [16, 1], strides = [1, 1]} : vector<16x4xf32> to vector<16x1xf32>
    %118 = vector.extract_strided_slice %20 {offsets = [0, 3], sizes = [16, 1], strides = [1, 1]} : vector<16x4xf32> to vector<16x1xf32>
    %119 = vector.shape_cast %118 : vector<16x1xf32> to vector<16xf32>
    %120 = vector.shape_cast %119 : vector<16xf32> to vector<1x16xf32>
    %121 = vector.broadcast %117 : vector<16x1xf32> to vector<16x16xf32>
    %122 = vector.broadcast %120 : vector<1x16xf32> to vector<16x16xf32>
    %123 = arith.addf %121, %122 : vector<16x16xf32>
    %cst_48 = arith.constant 0.000000e+00 : f32
    %124 = vector.broadcast %cst_48 : f32 to vector<16x16xf32>
    %125 = arith.cmpf oge, %123, %124 : vector<16x16xf32>
    %cst_49 = arith.constant 2.000000e-01 : f32
    %126 = vector.broadcast %cst_49 : f32 to vector<16x16xf32>
    %127 = arith.mulf %126, %123 : vector<16x16xf32>
    %128 = arith.select %125, %123, %127 : vector<16x16xi1>, vector<16x16xf32>
    %cst_50 = arith.constant -1.000000e+30 : f32
    %129 = vector.broadcast %cst_50 : f32 to vector<16x16xf32>
    %130 = arith.select %8, %128, %129 : vector<16x16xi1>, vector<16x16xf32>
    %cst_51 = arith.constant dense<0xFF800000> : vector<16xf32>
    %131 = vector.multi_reduction <maximumf>, %130, %cst_51 [1] : vector<16x16xf32> to vector<16xf32>
    %132 = vector.shape_cast %131 : vector<16xf32> to vector<16x1xf32>
    %133 = vector.broadcast %132 : vector<16x1xf32> to vector<16x16xf32>
    %134 = arith.subf %130, %133 : vector<16x16xf32>
    %135 = math.exp %134 : vector<16x16xf32>
    %cst_52 = arith.constant dense<0.000000e+00> : vector<16xf32>
    %136 = vector.multi_reduction <add>, %135, %cst_52 [1] : vector<16x16xf32> to vector<16xf32>
    %137 = vector.shape_cast %136 : vector<16xf32> to vector<16x1xf32>
    %138 = tpu.reciprocal %137 {approx = true} : vector<16x1xf32> -> vector<16x1xf32>
    %139 = arith.truncf %135 : vector<16x16xf32> to vector<16x16xbf16>
    %140 = vector.extract_strided_slice %13 {offsets = [0, 24], sizes = [16, 8], strides = [1, 1]} : vector<16x32xbf16> to vector<16x8xbf16>
    %cst_53 = arith.constant dense<0.000000e+00> : vector<16x8xf32>
    %141 = tpu.matmul %139, %140, %cst_53 {dimension_numbers = #tpu.dot_dimension_numbers<[1], [0], [0], [1], [0, 0, 1, 1], [], []>} : vector<16x16xbf16>, vector<16x8xbf16>, vector<16x8xf32> -> vector<16x8xf32>
    %142 = vector.broadcast %138 : vector<16x1xf32> to vector<16x8xf32>
    %143 = arith.mulf %141, %142 : vector<16x8xf32>
    %cst_54 = arith.constant 0.000000e+00 : f32
    %144 = vector.broadcast %cst_54 : f32 to vector<16x8xf32>
    %145 = arith.maximumf %143, %144 : vector<16x8xf32>
    %c0_55 = arith.constant 0 : index
    %c0_56 = arith.constant 0 : index
    %c24 = arith.constant 24 : index
    %146 = vector.load %arg9[%c0_55, %c0_56, %c24] : memref<1x16x32xf32, #tpu.memory_space<vmem>>, vector<1x16x8xf32>
    %147 = vector.shape_cast %146 : vector<1x16x8xf32> to vector<16x8xf32>
    %148 = vector.shape_cast %145 : vector<16x8xf32> to vector<1x16x8xf32>
    tpu.vector_store %arg9[%c0_55, %c0_56, %c24], %148 {strides = array<i32>} : memref<1x16x32xf32, #tpu.memory_space<vmem>>, vector<1x16x8xf32>,
    return
  }
  func.func @transform_0(%arg0: i32, %arg1: i32) -> (i32, i32, i32) {
    %c0_i32 = arith.constant 0 : i32
    %c0_i32_0 = arith.constant 0 : i32
    return %arg0, %arg1, %c0_i32 : i32, i32, i32
  }
  func.func @transform_1(%arg0: i32, %arg1: i32) -> (i32, i32, i32) {
    %c0_i32 = arith.constant 0 : i32
    %c0_i32_0 = arith.constant 0 : i32
    %c0_i32_1 = arith.constant 0 : i32
    return %arg0, %c0_i32, %c0_i32_0 : i32, i32, i32
  }
  func.func @transform_2(%arg0: i32, %arg1: i32) -> (i32, i32, i32) {
    %c0_i32 = arith.constant 0 : i32
    %c0_i32_0 = arith.constant 0 : i32
    return %arg0, %arg1, %c0_i32 : i32, i32, i32
  }
  func.func @transform_3(%arg0: i32, %arg1: i32) -> (i32, i32) {
    %c0_i32 = arith.constant 0 : i32
    %c0_i32_0 = arith.constant 0 : i32
    %c0_i32_1 = arith.constant 0 : i32
    return %c0_i32, %c0_i32_0 : i32, i32
  }
  func.func @transform_4(%arg0: i32, %arg1: i32) -> (i32, i32) {
    %c0_i32 = arith.constant 0 : i32
    %c0_i32_0 = arith.constant 0 : i32
    %c0_i32_1 = arith.constant 0 : i32
    return %c0_i32, %c0_i32_0 : i32, i32
  }
  func.func @transform_5(%arg0: i32, %arg1: i32) -> (i32, i32) {
    %c0_i32 = arith.constant 0 : i32
    %c0_i32_0 = arith.constant 0 : i32
    %c0_i32_1 = arith.constant 0 : i32
    return %c0_i32, %c0_i32_0 : i32, i32
  }
  func.func @transform_6(%arg0: i32, %arg1: i32) -> (i32, i32) {
    %c0_i32 = arith.constant 0 : i32
    %c0_i32_0 = arith.constant 0 : i32
    %c0_i32_1 = arith.constant 0 : i32
    return %c0_i32, %c0_i32_0 : i32, i32
  }
  func.func @transform_7(%arg0: i32, %arg1: i32) -> (i32, i32, i32) {
    %c0_i32 = arith.constant 0 : i32
    %c0_i32_0 = arith.constant 0 : i32
    return %arg0, %arg1, %c0_i32 : i32, i32, i32
  }
}

</mosaic_0001>

<bundles_post_ra>
// kernel: gat_layer.1
= control target key start
LH: loop header
LB: loop body
LE: loop exit
PB: predicated region body
PF: predicated region fallthrough
CT: control target
= control target key end

     0   :  { %12 = vsyncpa [#allocation3], 0  ;;  %s1547_s0 = inlined_call_operand.vmem [shape: bf16[2,16,32], index: 0, kind: input, shape index: {}, may-alias: {0,1}]   ;;  %s1548_s1 = inlined_call_operand.vmem [shape: bf16[2,16,32], index: 1, kind: input, shape index: {}, may-alias: {0,1}]   ;;  %s1549_s2 = inlined_call_operand.vmem [shape: s8[2,16,16], index: 2, kind: input, shape index: {}]   ;;  %s1550_s3 = inlined_call_operand.vmem [shape: bf16[32,32], index: 3, kind: input, shape index: {}]   ;;  %s1551_s4 = inlined_call_operand.vmem [shape: bf16[32,4], index: 4, kind: input, shape index: {}]   ;;  %s1552_s5 = inlined_call_operand.vmem [shape: bf16[32,4], index: 5, kind: input, shape index: {}]   ;;  %s1553_s6 = inlined_call_operand.vmem [shape: f32[1,4], index: 6, kind: input, shape index: {}]   ;;  %s1554_s7 = inlined_call_operand.hbm [shape: f32[2,16,32], index: 7, kind: output, shape index: {}]  }
   0x1   :  { %14 = vsyncpa [#allocation3 + $0x1], 0  ;;  %s1324_s24 = smov 0   ;;  %s1326_s25 = smov 0  }
   0x2   :  { %s1328_s26 = smov 0   ;;  %s1330_s27 = smov 0  }
   0x3   :  { %s1332_s28 = smov 0   ;;  %s1334_s29 = smov 0  }
   0x4 LB: > { %s1007_s30 = sadd.s32 4294967295, %s1271_s29   ;;  %s1008_s8 = sadd.s32 4294967294, %s1271_s29   ;;  %s1271_s29 = sphi %s1334_s29, %s20_s29   ;;  %s1267_s28 = sphi %s1332_s28, %s1561_s28   ;;  %s1263_s27 = sphi %s1330_s27, %s1560_s27   ;;  %s1259_s26 = sphi %s1328_s26, %s1559_s26   ;;  %s1255_s25 = sphi %s1326_s25, %s1558_s25   ;;  %s1251_s24 = sphi %s1324_s24, %s1557_s24  }
   0x5   : > { %s32_s9 = sadd.s32 1, %s1267_s28  ;;  %s207_s10 = sadd.s32 1, %s1259_s26 }
   0x6   : > { %p34_p0 = scmp.ge.s32.totalorder %s32_s9, 2  ;;  %p217_p1 = scmp.ne.s32.totalorder %s1259_s26, %s1255_s25 }
   0x7   : > { %p218_p2 = scmp.eq.s32.totalorder %s1007_s30, 1  ;;  %p223_p3 = scmp.ne.s32.totalorder %s1255_s25, %s1251_s24 }
   0x8   : > { %s1563_s9 = smov (%p34_p0, %s32_s9), 0  ;;  %p224_p5 = scmp.eq.s32.totalorder %s1008_s8, 1 }
   0x9   : > { %p1364_p4 = por %p218_p2, %p217_p1  ;;  %s202_s12 = ssub.s32 %s1267_s28, %s1563_s9 }
   0xa   : > { %p1011_p6 = scmp.ge.s32.totalorder %s1271_s29, 1  ;;  %p205_p7 = scmp.eq.s32.totalorder %s202_s12, 0 }
   0xb   : > { %p1371_p8 = por %p224_p5, %p223_p3  ;;  %p288_p9 = scmp.lt.s32.totalorder %s1271_s29, 3 }
   0xc   : > { %s1377_s14 = scalar_select %p205_p7, %s1259_s26, %s207_s10  }
   0xd   : > { %p289_p10 = pnand %p1011_p6, %p288_p9 }
   0xe   : > { %p339_p11 = scmp.lt.s32.totalorder (!%p289_p10), %s1263_s27, 1  ;;  %s1278_s16 = smov (!%p289_p10), 112  }
   0xf   : > { %292 = sbr.rel (%p289_p10) target bundleno = 876 (0x36c), region = 48  ;;  %s1279_s17 = smov (!%p289_p10), 120  }
  0x10   : > { %s1280_s18 = smov (!%p289_p10), 16   ;;  %s1282_s21 = smov (!%p289_p10), 24  }
  0x11   : > { %s335_s22 = sand.u32 (!%p289_p10), 1, %s1255_s25  }
  0x14   : > { %v1070_v0 = vld [vmem:[%s1550_s3 + $0x8] sm:$0xff]  ;;  %v1069_v1 = vld [vmem:[%s1550_s3] sm:$0xff]  ;;  %s1387_s19 = scalar_select %p339_p11, %s1263_s27, 1  ;;  %vm398_vm0 = vcmask 261120   ;;  %v1273_v18 = vmov 3   ;;  %v1274_v19 = vmov 2   ;;  %v534_v37 = vlaneseq }
  0x15   : > { %408 = vmatpush.bf16.msra.mxu0 %v1070_v0  ;;  %430 = vmatpush.bf16.msra.mxu1 %v1070_v0  ;;  %v1072_v4 = vld [vmem:[%s1551_s4 + $0x8] sm:$0xff]  ;;  %v1071_v5 = vld [vmem:[%s1551_s4] sm:$0xff]  ;;  %v1275_v20 = vmov 0   ;;  %v1276_v25 = vmov 1   ;;  %vm539_vm1 = vcmask 130112   ;;  %vm564_vm8 = vcmask 130048  }
  0x16   : > { %s1064_s20 = sshll.u32 %s1387_s19, 3  ;;  %470 = vmatpush.bf16.msra.mxu2 %v1072_v4  ;;  %v1074_v6 = vld [vmem:[%s1552_s5 + $0x8] sm:$0xff]  ;;  %v1073_v7 = vld [vmem:[%s1552_s5] sm:$0xff]  ;;  %1147 = vset.pattern.permute.xlu0 %v1273_v18  ;;  %s1066_s8 = sshll.u32 %s1387_s19, 2  ;;  %v1427_v40 = vand.u32 127, %v534_v37  ;;  %vm608_vm13 = vcmask 64512  }
  0x17   : > { %s346_s23 = scalar_lea.vmem %s1547_s0, %s1064_s20  ;;  %s352_s10 = scalar_lea.vmem %s1548_s1, %s1064_s20  ;;  %508 = vmatpush.bf16.msra.mxu3 %v1074_v6  ;;  %1146 = vset.pattern.permute.xlu2 %v1274_v19  ;;  %v1160_v21 = vld [vmem:[%s1553_s6] ss:$0 sm:$0xff]  ;;  %vm787_vm14 = vcmask 195712   ;;  %vm877_vm15 = vcmask 261312  }
  0x18   : > { %v1067_v2 = vld [vmem:[%s346_s23] sm:$0xff]  ;;  %1149 = vset.pattern.permute.xlu1 %v1275_v20  ;;  %s361_s15 = scalar_lea.vmem %s1549_s2, %s1066_s8  ;;  %v1430_v41 = vadd.s32 4294967288, %v1427_v40  ;;  %s1277_s19 = smov 104  }
  0x19   : > { %409 = vmatpush.bf16.msra.mxu0 %v1069_v1  ;;  %431 = vmatpush.bf16.msra.mxu1 %v1069_v1  ;;  %v1068_v3 = vld [vmem:[%s352_s10] sm:$0xff]  ;;  %s1281_s20 = smov 8   ;;  %s1012_s23 = sshll.u32 %s335_s22, 4 }
  0x1a   : > { %471 = vmatpush.bf16.msra.mxu2 %v1071_v5  ;;  %v1077_v39 = vld [vmem:[%s361_s15] sm:$0xf]   ;;  %s337_s30 = scalar_lea.vmem [#allocation2], %s1012_s23  ;;  %s1075_s8 = sshll.u32 %s1263_s27, 4 }
  0x1b   : > { %509 = vmatpush.bf16.msra.mxu3 %v1073_v7  ;;  %v1078_v42 = vunpack.c.0.s8 %v1077_v39  ;;  %v1079_v43 = vunpack.c.1.s8 %v1077_v39  ;;  %s894_s15 = scalar_lea.hbm %s1554_s7, %s1075_s8  ;;  %s1213_s8 = scalar_lea.hbm %s1554_s7, 32 }
  0x1c   : > { %1031 = vmatmul.msk.bf16.vlgmr.msra.gmra.mxu0 %vm398_vm0, %v1067_v2  ;;  %1036 = vmatmul.msk.bf16.vlgmr.msra.gmra.mxu1 %vm398_vm0, %v1068_v3 }
  0x1d   : > { %v1434_v49 = vcvt.s32.f32 %v1078_v42  ;;  %v1436_v50 = vcvt.s32.f32 %v1079_v43 }
  0x1f   : > { %vm375_vm2 = vcmp.gt.f32.partialorder %v1434_v49, 0.0  ;;  %vm376_vm3 = vcmp.gt.f32.partialorder %v1436_v50, 0.0 }
  0x99   : > { %v411_v8 = vpop.f32.mrf.mxu0  ;;  %v433_v9 = vpop.f32.mrf.mxu1 }
  0x9a   : > { %v439_v10 = vpack.c.bf16 %v433_v9, %v433_v9 }
  0x9c   : > { %v484_v13 = vunpack.c.l.b16 %v439_v10 }
  0xa1   : > { %v413_v11 = vpop.f32.mrf.mxu0  ;;  %v435_v12 = vpop.f32.mrf.mxu1 }
  0xa2   : > { %v438_v14 = vpack.c.bf16 %v413_v11, %v411_v8  ;;  %v440_v15 = vpack.c.bf16 %v435_v12, %v435_v12 }
  0xa4   : > { %v485_v16 = vunpack.c.l.b16 %v440_v15  ;;  %1045 = vmatmul.msk.bf16.vlgmr.msra.gmra.mxu2 %vm398_vm0, %v438_v14 }
  0xa6   : > { %v1411_v17 = vpack.c.b16 %v485_v16, %v484_v13 }
  0xa8   : > { %1054 = vmatmul.msk.bf16.vlgmr.msra.gmra.mxu3 %vm398_vm0, %v1411_v17  ;;  %597 = vmatpush.bf16.msrb.mxu0 %v1411_v17 }
 0x127   : > { %v473_v22 = vpop.f32.mrf.mxu2 }
 0x128   : > { %v474_v23 = vadd.f32 %v1160_v21, %v473_v22 }
 0x12a   : > { %518 = vperm.xlu1 %1149, %v474_v23   ;;  %791 = vperm.xlu0 %1147, %v474_v23  }
 0x12b   : > { %701 = vperm.xlu2 %1146, %v474_v23   ;;  %v511_v24 = vpop.f32.mrf.mxu3 }
 0x12f   : > { %v475_v26 = vpop.f32.mrf.mxu2 }
 0x130   : > { %v476_v27 = vadd.f32 %v1160_v21, %v475_v26 }
 0x132   : > { %1151 = vset.pattern.permute.xlu1 %v1273_v18  ;;  %1150 = vset.pattern.permute.xlu0 %v1274_v19 }
 0x133   : > { %1148 = vset.pattern.permute.xlu2 %v1276_v25  ;;  %799 = vperm.xlu1 %1151, %v511_v24   ;;  %v513_v28 = vpop.f32.mrf.mxu3 }
 0x134   : > { %709 = vperm.xlu0 %1150, %v511_v24   ;;  %612 = vperm.xlu2 %1148, %v474_v23  }
 0x13b   : > { %1152 = vset.pattern.permute.xlu1 %v1275_v20 }
 0x13c   : > { %1155 = vset.pattern.permute.xlu0 %v1276_v25  ;;  %620 = vperm.xlu2 %1148, %v511_v24  }
 0x13d   : > { %529 = vperm.xlu1 %1152, %v511_v24   ;;  %616 = vperm.xlu0 %1155, %v476_v27  }
 0x144   : > { %1153 = vset.pattern.permute.xlu2 %v1274_v19 }
 0x145   : > { %1154 = vset.pattern.permute.xlu1 %v1273_v18  ;;  %1157 = vset.pattern.permute.xlu0 %v1274_v19 }
 0x146   : > { %705 = vperm.xlu2 %1153, %v476_v27   ;;  %795 = vperm.xlu1 %1154, %v476_v27  }
 0x147   : > { %712 = vperm.xlu0 %1157, %v513_v28  }
 0x14e   : > { %1156 = vset.pattern.permute.xlu2 %v1275_v20  ;;  %802 = vperm.xlu1 %1154, %v513_v28  }
 0x14f   : > { %523 = vperm.xlu2 %1156, %v476_v27   ;;  %1159 = vset.pattern.permute.xlu0 %v1273_v18 }
 0x156   : > { %1158 = vset.pattern.permute.xlu1 %v1276_v25 }
 0x157   : > { %532 = vperm.xlu2 %1156, %v513_v28   ;;  %623 = vperm.xlu1 %1158, %v513_v28  }
 0x185   : > { %v702_v29 = vpop.permute.xlu2 %701 }
 0x18e   : > { %v1419_v30 = vpop.permute.xlu2 %612 }
 0x196   : > { %v1421_v31 = vpop.permute.xlu2 %620 }
 0x197   : > { %v625_v23 = vperm.slane %v1421_v31, %v1427_v40 }
 0x19c   : > { %v519_v32 = vpop.permute.xlu1 %518  ;;  %v792_v33 = vpop.permute.xlu0 %791 }
 0x1a0   : > { %v706_v34 = vpop.permute.xlu2 %705 }
 0x1a5   : > { %v800_v35 = vpop.permute.xlu1 %799 }
 0x1a6   : > { %v710_v36 = vpop.permute.xlu0 %709  ;;  %v804_v6 = vperm.slane %v800_v35, %v1427_v40 }
 0x1a7   : > { %v714_v60 = vperm.slane %v710_v36, %v1427_v40 }
 0x1a9   : > { %v524_v38 = vpop.permute.xlu2 %523 }
 0x1af   : > { %v530_v44 = vpop.permute.xlu1 %529  ;;  %v617_v45 = vpop.permute.xlu0 %616 }
 0x1b0   : > { %v536_v46 = vperm.slane %v530_v44, %v1427_v40 }
 0x1b1   : > { %v533_v47 = vpop.permute.xlu2 %532 }
 0x1b2   : > { %v538_v48 = vperm.slane %v533_v47, %v1430_v41 }
 0x1b4   : > { %v540_v51 = vsel %vm539_vm1, %v538_v48, %v536_v46 }
 0x1b5   : > { %v554_v52 = vadd.f32 %v540_v51, %v519_v32  ;;  %v555_v53 = vadd.f32 %v540_v51, %v524_v38 }
 0x1b7   : > { %vm556_vm4 = vcmp.ge.f32.partialorder %v554_v52, 0.0  ;;  %v558_v54 = vmul.f32 0.2, %v554_v52  ;;  %vm557_vm5 = vcmp.ge.f32.partialorder %v555_v53, 0.0  ;;  %v559_v55 = vmul.f32 0.2, %v555_v53 }
 0x1b8   : > { %v796_v56 = vpop.permute.xlu1 %795 }
 0x1b9   : > { %v713_v57 = vpop.permute.xlu0 %712  ;;  %v560_v58 = vsel %vm556_vm4, %v554_v52, %v558_v54  ;;  %v561_v59 = vsel %vm557_vm5, %v555_v53, %v559_v55 }
 0x1ba   : > { %v715_v61 = vperm.slane %v713_v57, %v1430_v41  ;;  %v1445_v62 = vsel %vm375_vm2, %v560_v58, -1e+30  ;;  %v1449_v63 = vsel %vm376_vm3, %v561_v59, -1e+30 }
 0x1bb   : > { %v565_v40 = vsel %vm564_vm8, %v1445_v62, -inf }
 0x1bc   : > { %v716_v0 = vsel %vm539_vm1, %v715_v61, %v714_v60 }
 0x1bd   : > { %v724_v1 = vadd.f32 %v716_v0, %v702_v29  ;;  %v725_v2 = vadd.f32 %v716_v0, %v706_v34 }
 0x1bf   : > { %vm726_vm6 = vcmp.ge.f32.partialorder %v724_v1, 0.0  ;;  %v728_v3 = vmul.f32 0.2, %v724_v1  ;;  %vm727_vm7 = vcmp.ge.f32.partialorder %v725_v2, 0.0  ;;  %v729_v4 = vmul.f32 0.2, %v725_v2 }
 0x1c0   : > { %v803_v5 = vpop.permute.xlu1 %802 }
 0x1c1   : > { %v805_v7 = vperm.slane %v803_v5, %v1430_v41  ;;  %v730_v8 = vsel %vm726_vm6, %v724_v1, %v728_v3  ;;  %v731_v9 = vsel %vm727_vm7, %v725_v2, %v729_v4 }
 0x1c2   : > { %v732_v10 = vsel %vm375_vm2, %v730_v8, -1e+30  ;;  %v733_v11 = vsel %vm376_vm3, %v731_v9, -1e+30 }
 0x1c3   : > { %v806_v12 = vsel %vm539_vm1, %v805_v7, %v804_v6  ;;  %v734_v13 = vsel %vm564_vm8, %v732_v10, -inf  ;;  %v737_v14 = vsel %vm564_vm8, %v733_v11, -inf }
 0x1c4   : > { %v814_v15 = vadd.f32 %v806_v12, %v792_v33  ;;  %v815_v16 = vadd.f32 %v806_v12, %v796_v56  ;;  %735 = vmax.xlane.f32.xlu0 %v734_v13  ;;  %738 = vmax.xlane.f32.xlu1 %v737_v14 }
 0x1c6   : > { %vm816_vm9 = vcmp.ge.f32.partialorder %v814_v15, 0.0  ;;  %v818_v18 = vmul.f32 0.2, %v814_v15  ;;  %v819_v19 = vmul.f32 0.2, %v815_v16  ;;  %vm817_vm10 = vcmp.ge.f32.partialorder %v815_v16, 0.0 }
 0x1c8   : > { %v820_v20 = vsel %vm816_vm9, %v814_v15, %v818_v18  ;;  %v821_v26 = vsel %vm817_vm10, %v815_v16, %v819_v19 }
 0x1c9   : > { %v624_v21 = vpop.permute.xlu1 %623  ;;  %v822_v22 = vsel %vm375_vm2, %v820_v20, -1e+30  ;;  %v823_v32 = vsel %vm376_vm3, %v821_v26, -1e+30 }
 0x1ca   : > { %v626_v24 = vperm.slane %v624_v21, %v1430_v41  ;;  %v824_v25 = vsel %vm564_vm8, %v822_v22, -inf  ;;  %v827_v36 = vsel %vm564_vm8, %v823_v32, -inf  ;;  %v568_v41 = vsel %vm564_vm8, %v1449_v63, -inf }
 0x1cb   : > { %825 = vmax.xlane.f32.xlu2 %v824_v25 }
 0x1cc   : > { %v627_v27 = vsel %vm539_vm1, %v626_v24, %v625_v23 }
 0x1cd   : > { %v635_v28 = vadd.f32 %v627_v27, %v1419_v30  ;;  %v636_v29 = vadd.f32 %v627_v27, %v617_v45 }
 0x1cf   : > { %vm637_vm11 = vcmp.ge.f32.partialorder %v635_v28, 0.0  ;;  %v639_v33 = vmul.f32 0.2, %v635_v28  ;;  %vm638_vm12 = vcmp.ge.f32.partialorder %v636_v29, 0.0  ;;  %v640_v34 = vmul.f32 0.2, %v636_v29 }
 0x1d1   : > { %v641_v35 = vsel %vm637_vm11, %v635_v28, %v639_v33  ;;  %v642_v31 = vsel %vm638_vm12, %v636_v29, %v640_v34 }
 0x1d2   : > { %v643_v37 = vsel %vm375_vm2, %v641_v35, -1e+30  ;;  %v644_v38 = vsel %vm376_vm3, %v642_v31, -1e+30 }
 0x1d3   : > { %828 = vmax.xlane.f32.xlu2 %v827_v36  ;;  %v645_v30 = vsel %vm564_vm8, %v643_v37, -inf  ;;  %v648_v39 = vsel %vm564_vm8, %v644_v38, -inf }
 0x1d4   : > { %646 = vmax.xlane.f32.xlu0 %v645_v30  ;;  %649 = vmax.xlane.f32.xlu1 %v648_v39 }
 0x1e8   : > { %845 = vrot.lane.b32.xlu0 %v1411_v17, %s1277_s19  ;;  %s895_s19 = sshll.u32 %s337_s30, 4  ;;  %s896_s19 = int_to_ptr.vmem [resolvable:$true] %s895_s19 }
 0x1eb   : > { %755 = vrot.lane.b32.xlu2 %v1411_v17, %s1278_s16  ;;  %s897_s16 = sshll.u32 %s894_s15, 4  ;;  %s898_s16 = int_to_ptr.hbm [resolvable:$true] %s897_s16 }
 0x1ed   : > { %666 = vrot.lane.b32.xlu1 %v1411_v17, %s1279_s17  ;;  %s881_s17 = scalar_lea.sflag [#allocation3], %s335_s22 }
 0x212   : > { %566 = vmax.xlane.f32.xlu0 %v565_v40 }
 0x214   : > { %569 = vmax.xlane.f32.xlu2 %v568_v41 }
 0x237   : > { %v736_v42 = vpop.xlane.xlu0 %735  ;;  %v739_v45 = vpop.xlane.xlu1 %738 }
 0x238   : > { %v740_v43 = vsub.f32 %v732_v10, %v736_v42  ;;  %v741_v47 = vsub.f32 %v733_v11, %v739_v45 }
 0x23a   : > { %v742_v44 = vmul.f32 1.442695, %v740_v43  ;;  %v744_v49 = vmul.f32 1.442695, %v741_v47 }
 0x23c   : > { %1161 = vpow2.f32 %v742_v44 }
 0x23d   : > { %1163 = vpow2.f32 %v744_v49 }
 0x23e   : > { %v826_v46 = vpop.xlane.xlu2 %825 }
 0x23f   : > { %v830_v59 = vsub.f32 %v822_v22, %v826_v46 }
 0x241   : > { %v832_v0 = vmul.f32 1.442695, %v830_v59 }
 0x242   : > { %v1162_v48 = vpop.eup %1161 }
 0x243   : > { %v746_v50 = vsel %vm564_vm8, %v1162_v48, 0.0  ;;  %v1164_v60 = vpop.eup %1163 }
 0x244   : > { %747 = vadd.xlane.f32.xlu2 %v746_v50  ;;  %v754_v1 = vpack.c.bf16 %v1164_v60, %v1162_v48  ;;  %v749_v10 = vsel %vm564_vm8, %v1164_v60, 0.0 }
 0x246   : > { %v829_v17 = vpop.xlane.xlu2 %828 }
 0x247   : > { %v831_v51 = vsub.f32 %v823_v32, %v829_v17  ;;  %v647_v52 = vpop.xlane.xlu0 %646  ;;  %v650_v53 = vpop.xlane.xlu1 %649 }
 0x248   : > { %v651_v54 = vsub.f32 %v643_v37, %v647_v52  ;;  %v652_v55 = vsub.f32 %v644_v38, %v650_v53 }
 0x249   : > { %v834_v56 = vmul.f32 1.442695, %v831_v51 }
 0x24a   : > { %v653_v57 = vmul.f32 1.442695, %v651_v54  ;;  %v655_v58 = vmul.f32 1.442695, %v652_v55 }
 0x24b   : > { %1165 = vpow2.f32 %v834_v56 }
 0x24c   : > { %1167 = vpow2.f32 %v653_v57 }
 0x24d   : > { %1169 = vpow2.f32 %v655_v58 }
 0x24e   : > { %v756_v61 = vpop.permute.xlu2 %755  ;;  %1171 = vpow2.f32 %v832_v0 }
 0x24f   : > { %768 = vmatpush.bf16.msrb.mxu2 %v756_v61 }
 0x251   : > { %v1166_v2 = vpop.eup %1165 }
 0x252   : > { %v1168_v3 = vpop.eup %1167  ;;  %1057 = vmatmul.msk.bf16.vlgmr.msrb.gmra.mxu2 %vm564_vm8, %v754_v1  ;;  %v839_v4 = vsel %vm564_vm8, %v1166_v2, 0.0 }
 0x253   : > { %v1170_v5 = vpop.eup %1169  ;;  %840 = vadd.xlane.f32.xlu2 %v839_v4  ;;  %v657_v6 = vsel %vm564_vm8, %v1168_v3, 0.0 }
 0x254   : > { %658 = vadd.xlane.f32.xlu1 %v657_v6  ;;  %v660_v7 = vsel %vm564_vm8, %v1170_v5, 0.0  ;;  %v1172_v8 = vpop.eup %1171  ;;  %v665_v14 = vpack.c.bf16 %v1170_v5, %v1168_v3 }
 0x255   : > { %661 = vadd.xlane.f32.xlu0 %v660_v7  ;;  %v836_v11 = vsel %vm564_vm8, %v1172_v8, 0.0  ;;  %v844_v12 = vpack.c.bf16 %v1166_v2, %v1172_v8 }
 0x25a   : > { %v846_v9 = vpop.permute.xlu0 %845 }
 0x25b   : > { %858 = vmatpush.bf16.msrb.mxu3 %v846_v9 }
 0x25c   : > { %750 = vadd.xlane.f32.xlu1 %v749_v10 }
 0x25d   : > { %837 = vadd.xlane.f32.xlu0 %v836_v11 }
 0x25e   : > { %1058 = vmatmul.msk.bf16.vlgmr.msrb.gmra.mxu3 %vm564_vm8, %v844_v12 }
 0x25f   : > { %v667_v13 = vpop.permute.xlu1 %666 }
 0x260   : > { %679 = vmatpush.bf16.msrb.mxu1 %v667_v13 }
 0x263   : > { %1056 = vmatmul.msk.bf16.vlgmr.msrb.gmra.mxu1 %vm564_vm8, %v665_v14 }
 0x285   : > { %v567_v15 = vpop.xlane.xlu0 %566 }
 0x286   : > { %v571_v16 = vsub.f32 %v1445_v62, %v567_v15 }
 0x287   : > { %v570_v18 = vpop.xlane.xlu2 %569 }
 0x288   : > { %v573_v19 = vmul.f32 1.442695, %v571_v16  ;;  %v572_v20 = vsub.f32 %v1449_v63, %v570_v18 }
 0x28a   : > { %1173 = vpow2.f32 %v573_v19  ;;  %v575_v21 = vmul.f32 1.442695, %v572_v20 }
 0x28c   : > { %1175 = vpow2.f32 %v575_v21 }
 0x290   : > { %v1174_v22 = vpop.eup %1173 }
 0x291   : > { %v577_v23 = vsel %vm564_vm8, %v1174_v22, 0.0 }
 0x292   : > { %v1176_v24 = vpop.eup %1175  ;;  %578 = vadd.xlane.f32.xlu1 %v577_v23 }
 0x293   : > { %v580_v25 = vsel %vm564_vm8, %v1176_v24, 0.0  ;;  %v585_v26 = vpack.c.bf16 %v1176_v24, %v1174_v22 }
 0x294   : > { %581 = vadd.xlane.f32.xlu0 %v580_v25 }
 0x295   : > { %1055 = vmatmul.msk.bf16.vlgmr.msrb.gmra.mxu0 %vm564_vm8, %v585_v26 }
 0x2b7   : > { %v748_v27 = vpop.xlane.xlu2 %747 }
 0x2b8   : > { %1177 = vrcp.f32 %v748_v27 }
 0x2be   : > { %v1178_v29 = vpop.eup %1177 }
 0x2c6   : > { %v841_v43 = vpop.xlane.xlu2 %840 }
 0x2c7   : > { %v659_v28 = vpop.xlane.xlu1 %658 }
 0x2c8   : > { %v662_v62 = vpop.xlane.xlu0 %661  ;;  %1179 = vrcp.f32 %v659_v28 }
 0x2ce   : > { %v1180_v31 = vpop.eup %1179 }
 0x2cf   : > { %v751_v35 = vpop.xlane.xlu1 %750 }
 0x2d0   : > { %v838_v33 = vpop.xlane.xlu0 %837 }
 0x2d1   : > { %1181 = vrcp.f32 %v838_v33 }
 0x2d2   : > { %1183 = vrcp.f32 %v751_v35 }
 0x2d3   : > { %1185 = vrcp.f32 %v662_v62 }
 0x2d4   : > { %1187 = vrcp.f32 %v841_v43 }
 0x2d5   : > { %v770_v63 = vpop.f32.mrf.mxu2 }
 0x2d6   : > { %v775_v32 = vmul.f32 %v1178_v29, %v770_v63 }
 0x2d7   : > { %v1182_v37 = vpop.eup %1181 }
 0x2d8   : > { %v777_v34 = vmax.f32 %v775_v32, 0.0  ;;  %v1184_v44 = vpop.eup %1183 }
 0x2d9   : > { %v1186_v46 = vpop.eup %1185 }
 0x2da   : > { %781 = vrot.lane.b32.xlu0 %v777_v34, %s1280_s18  ;;  %v1188_v51 = vpop.eup %1187 }
 0x2dd   : > { %v772_v41 = vpop.f32.mrf.mxu2 }
 0x2de   : > { %v776_v45 = vmul.f32 %v1184_v44, %v772_v41 }
 0x2e0   : > { %v681_v36 = vpop.f32.mrf.mxu1  ;;  %v778_v49 = vmax.f32 %v776_v45, 0.0 }
 0x2e1   : > { %v686_v38 = vmul.f32 %v1180_v31, %v681_v36  ;;  %v860_v30 = vpop.f32.mrf.mxu3 }
 0x2e2   : > { %v865_v39 = vmul.f32 %v1182_v37, %v860_v30 }
 0x2e3   : > { %v688_v40 = vmax.f32 %v686_v38, 0.0 }
 0x2e4   : > { %v867_v42 = vmax.f32 %v865_v39, 0.0 }
 0x2e5   : > { %692 = vrot.lane.b32.xlu2 %v688_v40, %s1281_s20 }
 0x2e6   : > { %871 = vrot.lane.b32.xlu0 %v867_v42, %s1282_s21 }
 0x2e8   : > { %v683_v47 = vpop.f32.mrf.mxu1 }
 0x2e9   : > { %v687_v48 = vmul.f32 %v1186_v46, %v683_v47  ;;  %v862_v17 = vpop.f32.mrf.mxu3 }
 0x2ea   : > { %v866_v52 = vmul.f32 %v1188_v51, %v862_v17 }
 0x2eb   : > { %v689_v50 = vmax.f32 %v687_v48, 0.0 }
 0x2ec   : > { %v868_v53 = vmax.f32 %v866_v52, 0.0 }
 0x2ed   : > { %694 = vrot.lane.b32.xlu1 %v689_v50, %s1281_s20  ;;  %783 = vrot.lane.b32.xlu2 %v778_v49, %s1280_s18  ;;  %s1207_s18 = sshra.s32 %s898_s16, 4  ;;  %s1208_s18 = int_to_ptr.hbm [resolvable:$true] %s1207_s18 }
 0x2ee   : > { %s1209_s27 = scalar_lea.hbm %s1208_s18, 16  ;;  %p1214_p1 = scmp.lt.s32.totalorder %s1208_s18, %s1554_s7 }
 0x2ef   : > { %p1210_p12 = scmp.ne.s32.totalorder %s1208_s18, %s1209_s27  ;;  %p1215_p2 = scmp.lt.s32.totalorder %s1213_s8, %s1209_s27 }
 0x2f1   : > { %p1211_p13 = pnand %p1210_p12, %p1364_p4  ;;  %p1216_p3 = por %p1215_p2, %p1214_p1 }
 0x2f3   : > { %p1212_p0 = pneg %p1211_p13 }
 0x2f5   : > { %873 = vrot.lane.b32.xlu1 %v868_v53, %s1282_s21  ;;  %p1217_p5 = pnand %p1216_p3, %p1212_p0 }
 0x305   : > { %v579_v54 = vpop.xlane.xlu1 %578 }
 0x306   : > { %1189 = vrcp.f32 %v579_v54 }
 0x307   : > { %v582_v55 = vpop.xlane.xlu0 %581 }
 0x308   : > { %1191 = vrcp.f32 %v582_v55 }
 0x30c   : > { %v1190_v56 = vpop.eup %1189 }
 0x30e   : > { %v1192_v60 = vpop.eup %1191 }
 0x312   : > { %v599_v57 = vpop.f32.mrf.mxu0 }
 0x313   : > { %v604_v58 = vmul.f32 %v1190_v56, %v599_v57 }
 0x315   : > { %v606_v59 = vmax.f32 %v604_v58, 0.0 }
 0x317   : > { %609 = vst.msk [vmem:[%s337_s30] sm:$0xff] %vm608_vm13, %v606_v59 }
 0x31a   : > { %v601_v61 = vpop.f32.mrf.mxu0 }
 0x31b   : > { %v605_v0 = vmul.f32 %v1192_v60, %v601_v61 }
 0x31d   : > { %v607_v1 = vmax.f32 %v605_v0, 0.0 }
 0x31f   : > { %610 = vst.msk [vmem:[%s337_s30 + $0x8] sm:$0xff] %vm608_vm13, %v607_v1 }
 0x33f   : > { %v693_v2 = vpop.permute.xlu2 %692 }
 0x340   : > { %698 = vst.msk [vmem:[%s337_s30] sm:$0xff] %vm539_vm1, %v693_v2 }
 0x347   : > { %v784_v6 = vpop.permute.xlu2 %783 }
 0x34c   : > { %v782_v3 = vpop.permute.xlu0 %781 }
 0x34d   : > { %788 = vst.msk [vmem:[%s337_s30] sm:$0xff] %vm787_vm14, %v782_v3 }
 0x358   : > { %v872_v4 = vpop.permute.xlu0 %871 }
 0x359   : > { %878 = vst.msk [vmem:[%s337_s30] sm:$0xff] %vm877_vm15, %v872_v4 }
 0x35f   : > { %v695_v5 = vpop.permute.xlu1 %694 }
 0x360   : > { %699 = vst.msk [vmem:[%s337_s30 + $0x8] sm:$0xff] %vm539_vm1, %v695_v5 }
 0x361   : > { %789 = vst.msk [vmem:[%s337_s30 + $0x8] sm:$0xff] %vm787_vm14, %v784_v6 }
 0x367   : > { %v874_v7 = vpop.permute.xlu1 %873 }
 0x368   : > { %879 = vst.msk [vmem:[%s337_s30 + $0x8] sm:$0xff] %vm877_vm15, %v874_v7 }
 0x369   : > { %1220 = shalt.err (!%p1217_p5)
}
 0x36a   : > { %s1283_s22 = smov 128  }
 0x36b   : > { %1080 = dma.vmem_to_hbm [thread:$0]  (%p1364_p4), %s896_s19, 256, %s898_s16, %s881_s17, %s1283_s22, %s1283_s22, %s1281_s20  }
 0x36c PF: > { %p1086_p6 = scmp.ge.s32.totalorder %s1271_s29, 2  ;;  %s912_s30 = sand.u32 1, %s1251_s24  }
 0x36d   : > { %s913_s15 = scalar_lea.sflag [#allocation3], %s912_s30 }
 0x36e   : > { %p1083_p7 = pnand %p1086_p6, %p1371_p8 }
 0x370   : > { %p1084_p9 = pneg %p1083_p7 }
 0x372   : > { %1246 = dma.done.wait (%p1084_p9), %s913_s15, 256  }
 0x373   : > { %1248 = vsyncadd (%p1084_p9), %s913_s15, 4294967040  ;;  %s20_s29 = sadd.s32 1, %s1271_s29   ;;  %s1557_s24 = smov %s1255_s25 }
 0x374   : > { %p17_p10 = scmp.ge.s32.totalorder %s20_s29, 4   ;;  %s1558_s25 = smov %s1259_s26 }
 0x375   : > { %s1559_s26 = smov %s1377_s14  ;;  %s1560_s27 = smov %s1267_s28 }
 0x376   : > { %s1561_s28 = smov %s1563_s9  ;;  %19 = sbr.rel (!%p17_p10) target bundleno = 4 (0x4), region = 89 }
 0x37b   :  { %919 = vsyncpa [#allocation3], 1 }
 0x37c   :  { %921 = vsyncpa [#allocation3 + $0x1], 1 }

</bundles_post_ra>
